<compile_context>
chip_gen: v5e
topology: v5e:2x2
jax: 0.10.0
libtpu: 0.0.40
codegen_flags: <defaults>
</compile_context>

<pallas_src>
import jax
import jax.numpy as jnp
from jax.experimental import pallas as pl
from jax.experimental.pallas import tpu as pltpu

LAYERSIZES = [2, 32, 32, 32, 1]   # DenseNet default: 3 hidden layers of 32, sigmoid
CHUNK = 512                       # lanes per inner chunk: (32,512) f32 acts = 16 vregs
MAX_TILE = 32768                  # lane cap per grid step (amortizes step overhead)


# ----------------------------------------------------------------------------
# One-time parameter transform (host side).
# ----------------------------------------------------------------------------
def prepare_densenet_params(params):
    """Fold sigmoid(z) = 0.5*tanh(0.5 z) + 0.5 into the weights, reshape biases to
    (out, 1) columns, lay the M=1 output layer out as an (in, 1) column for the
    VPU-reduction path, and pre-cast MXU-layer weights to bf16.

    Returns (flat_args, plan):
      flat_args: [V1, c1, V2, c2, ...]  ready to pass to the kernel
      plan:      per-layer tag ("fma" | "mxu" | "reduce", dim_in)
    """
    L = len(params)
    flat, plan = [], []
    for i, (w, b) in enumerate(params):
        w = jnp.asarray(w, jnp.float32)
        b = jnp.asarray(b, jnp.float32)
        dim_out, dim_in = w.shape
        if L == 1:                           # single linear layer: no activation
            v, c = w, b
        elif i == 0:                         # tanh(0.5*(W x + b))
            v, c = 0.5 * w, 0.5 * b
        elif i < L - 1:                      # tanh(0.5*(W (0.5 t + 0.5) + b))
            v, c = 0.25 * w, 0.5 * b + 0.25 * w.sum(axis=1)
        else:                                # W (0.5 t + 0.5) + b
            v, c = 0.5 * w, b + 0.5 * w.sum(axis=1)
        c = c.reshape(dim_out, 1)

        if i == 0 and dim_in <= 8:
            plan.append(("fma", dim_in))     # K tiny: VPU broadcast FMAs, f32
        elif i == L - 1 and dim_out == 1:
            plan.append(("reduce", dim_in))  # M=1: VPU mul + sublane reduce, f32
            v = v.reshape(dim_in, 1)
        else:
            plan.append(("mxu", dim_in))     # MXU with bf16 operands, f32 accumulate
            v = v.astype(jnp.bfloat16)
        flat.append(v)
        flat.append(c)
    return flat, tuple(plan)


# ----------------------------------------------------------------------------
# Kernel: one grid step = tile_chunks * CHUNK batch columns, inner chunk loop.
# ----------------------------------------------------------------------------
def _make_kernel(plan, tile_chunks, chunk):
    nlayers = len(plan)

    def kernel(*refs):
        x_ref, o_ref = refs[0], refs[-1]      # (dim_in, tile_n), (dim_out, tile_n)
        wb = refs[1:-1]                       # V1, c1, V2, c2, ...

        @pl.loop(0, tile_chunks)
        def _(cidx):
            off = pl.multiple_of(cidx * chunk, chunk)
            h = x_ref[:, pl.ds(off, chunk)]                 # (dim_in, chunk) f32
            for i, (kind, dim_in) in enumerate(plan):
                v = wb[2 * i][...]
                c = wb[2 * i + 1][...]
                if kind == "fma":
                    # K<=8: unrolled lane/sublane-broadcast FMAs on the VPU.
                    z = c
                    for k in range(dim_in):
                        z = z + v[:, k:k + 1] * h[k:k + 1, :]
                elif kind == "mxu":
                    # bf16 operands, f32 accumulation on the MXU.
                    z = jnp.dot(v, h.astype(jnp.bfloat16),
                                preferred_element_type=jnp.float32) + c
                else:  # "reduce": M == 1 output layer, VPU mul + XLU sublane sum.
                    z = jnp.sum(v * h, axis=0, keepdims=True) + c
                h = jnp.tanh(z) if i < nlayers - 1 else z   # single EUP op / layer
            o_ref[:, pl.ds(off, chunk)] = h.astype(o_ref.dtype)

    return kernel


# ----------------------------------------------------------------------------
# Wrappers.
# ----------------------------------------------------------------------------
def _pick_tiling(n):
    """Return (grid, tile_chunks). Keeps grid >= 2 when possible (v7x: 2 TCs)."""
    n_chunks = pl.cdiv(n, CHUNK)
    max_chunks = MAX_TILE // CHUNK
    grid = max(1, pl.cdiv(n_chunks, max_chunks))
    if n_chunks >= 2:
        grid = max(grid, 2)
    tile_chunks = pl.cdiv(n_chunks, grid)
    return grid, tile_chunks


def densenet_apply_fm(flat_params, plan, x_fm):
    """Core forward. x_fm: (dim_in, N) feature-major f32 -> (dim_out, N) f32."""
    dim_in, n = x_fm.shape
    dim_out = flat_params[-1].shape[0]
    grid, tile_chunks = _pick_tiling(n)
    tile_n = tile_chunks * CHUNK
    n_pad = grid * tile_n
    if n_pad != n:
        # TODO(synk): mask the ragged tail chunk in-kernel instead of padding.
        x_fm = jnp.pad(x_fm, ((0, 0), (0, n_pad - n)))

    in_specs = [pl.BlockSpec((dim_in, tile_n), lambda i: (0, i))]
    for a in flat_params:
        in_specs.append(pl.BlockSpec(a.shape, lambda i: (0, 0)))

    out = pl.pallas_call(
        _make_kernel(plan, tile_chunks, CHUNK),
        out_shape=jax.ShapeDtypeStruct((dim_out, n_pad), jnp.float32),
        grid_spec=pltpu.PrefetchScalarGridSpec(
            num_scalar_prefetch=0,
            grid=(grid,),
            in_specs=in_specs,
            out_specs=pl.BlockSpec((dim_out, tile_n), lambda i: (0, i)),
        ),
        compiler_params=pltpu.CompilerParams(
            dimension_semantics=("parallel",)),   # batch axis shards across TCs
    )(x_fm, *flat_params)
    return out[:, :n]


def densenet_forward(x, params):
    """PyTorch-semantics entry point: x (N, dim_in) -> (N, dim_out).

    The transpose is wrapper plumbing for API compatibility; for large batches,
    prepare params once and feed densenet_apply_fm a feature-major array directly.
    """
    flat, plan = prepare_densenet_params(params)
    return densenet_apply_fm(flat, plan, x.T).T


# ----------------------------------------------------------------------------
# Init + plain-JAX reference (mirrors the PyTorch module exactly, in f32).
# ----------------------------------------------------------------------------
def init_params(key, layersizes):
    params = []
    for i in range(len(layersizes) - 1):
        fan_in, fan_out = layersizes[i], layersizes[i + 1]
        key, kw, kb = jax.random.split(key, 3)
        bound = 1.0 / jnp.sqrt(fan_in)
        w = jax.random.uniform(kw, (fan_out, fan_in), jnp.float32, -bound, bound)
        b = jax.random.uniform(kb, (fan_out,), jnp.float32, -bound, bound)
        params.append((w, b))
    return params


def densenet_reference(x, params):
    h = x
    for (w, b) in params[:-1]:
        h = jax.nn.sigmoid(h @ w.T + b)
    w, b = params[-1]
    return h @ w.T + b


if __name__ == "__main__":
    key = jax.random.PRNGKey(0)
    key, kx = jax.random.split(key)

    # Ragged batch: exercises grid=2 (two tiles), the inner chunk loop, and padding.
    batch = 2000
    x = jax.random.normal(kx, (batch, LAYERSIZES[0]), dtype=jnp.float32)
    params = init_params(key, LAYERSIZES)

    out = densenet_forward(x, params)
    out = jax.block_until_ready(out)

    ref = densenet_reference(x, params)
    assert out.shape == (batch, LAYERSIZES[-1])
    # bf16 MXU operands (f32 accumulation) -> relaxed tolerance vs the f32 reference.
    assert jnp.allclose(out, ref, atol=1e-2, rtol=1e-2), "mismatch vs reference"

    print("KERNEL_OK")
</pallas_src>

<mosaic_0001>
module attributes {stable_mosaic.version = 11 : i64} {
  func.func @kernel(%arg0: i32, %arg1: memref<2x1024xf32, #tpu.memory_space<vmem>>, %arg2: memref<32x2xf32, #tpu.memory_space<vmem>>, %arg3: memref<32x1xf32, #tpu.memory_space<vmem>>, %arg4: memref<32x32xbf16, #tpu.memory_space<vmem>>, %arg5: memref<32x1xf32, #tpu.memory_space<vmem>>, %arg6: memref<32x32xbf16, #tpu.memory_space<vmem>>, %arg7: memref<32x1xf32, #tpu.memory_space<vmem>>, %arg8: memref<32x1xf32, #tpu.memory_space<vmem>>, %arg9: memref<1x1xf32, #tpu.memory_space<vmem>>, %arg10: memref<1x1024xf32, #tpu.memory_space<vmem>>) attributes {dimension_semantics = [#tpu.dimension_semantics<parallel>], iteration_bounds = array<i64: 2>, scalar_prefetch = 0 : i64, scratch_operands = 0 : i64, tpu.core_type = #tpu.core_type<tc>, window_params = [{transform_indices = @transform_0, window_bounds = array<i64: 2, 1024>}, {pipeline_mode = #tpu.pipeline_mode<synchronous>, transform_indices = @transform_1, window_bounds = array<i64: 32, 2>}, {pipeline_mode = #tpu.pipeline_mode<synchronous>, transform_indices = @transform_2, window_bounds = array<i64: 32, 1>}, {pipeline_mode = #tpu.pipeline_mode<synchronous>, transform_indices = @transform_3, window_bounds = array<i64: 32, 32>}, {pipeline_mode = #tpu.pipeline_mode<synchronous>, transform_indices = @transform_4, window_bounds = array<i64: 32, 1>}, {pipeline_mode = #tpu.pipeline_mode<synchronous>, transform_indices = @transform_5, window_bounds = array<i64: 32, 32>}, {pipeline_mode = #tpu.pipeline_mode<synchronous>, transform_indices = @transform_6, window_bounds = array<i64: 32, 1>}, {pipeline_mode = #tpu.pipeline_mode<synchronous>, transform_indices = @transform_7, window_bounds = array<i64: 32, 1>}, {pipeline_mode = #tpu.pipeline_mode<synchronous>, transform_indices = @transform_8, window_bounds = array<i64: 1, 1>}, {transform_indices = @transform_9, window_bounds = array<i64: 1, 1024>}]} {
    %c0_i32 = arith.constant 0 : i32
    %c2_i32 = arith.constant 2 : i32
    %0 = arith.addi %c0_i32, %c2_i32 : i32
    %c1_i32 = arith.constant 1 : i32
    scf.for %arg11 = %c0_i32 to %0 step %c1_i32  : i32 {
      %c1_i32_1 = arith.constant 1 : i32
      %1 = arith.muli %arg11, %c1_i32_1 : i32
      %c0_i32_2 = arith.constant 0 : i32
      %2 = arith.addi %c0_i32_2, %1 : i32
      %c512_i32 = arith.constant 512 : i32
      %3 = arith.muli %2, %c512_i32 : i32
      %4 = tpu.assume_multiple %3, 512 : i32
      %c0 = arith.constant 0 : index
      %5 = arith.index_cast %4 : i32 to index
      %6 = vector.load %arg1[%c0, %5] : memref<2x1024xf32, #tpu.memory_space<vmem>>, vector<2x512xf32>
      %c0_3 = arith.constant 0 : index
      %c0_4 = arith.constant 0 : index
      %7 = vector.load %arg2[%c0_3, %c0_4] : memref<32x2xf32, #tpu.memory_space<vmem>>, vector<32x2xf32>
      %c0_5 = arith.constant 0 : index
      %c0_6 = arith.constant 0 : index
      %8 = vector.load %arg3[%c0_5, %c0_6] : memref<32x1xf32, #tpu.memory_space<vmem>>, vector<32x1xf32>
      %9 = vector.extract_strided_slice %7 {offsets = [0, 0], sizes = [32, 1], strides = [1, 1]} : vector<32x2xf32> to vector<32x1xf32>
      %10 = vector.extract_strided_slice %6 {offsets = [0, 0], sizes = [1, 512], strides = [1, 1]} : vector<2x512xf32> to vector<1x512xf32>
      %11 = vector.broadcast %9 : vector<32x1xf32> to vector<32x512xf32>
      %12 = vector.broadcast %10 : vector<1x512xf32> to vector<32x512xf32>
      %13 = arith.mulf %11, %12 : vector<32x512xf32>
      %14 = vector.broadcast %8 : vector<32x1xf32> to vector<32x512xf32>
      %15 = arith.addf %14, %13 : vector<32x512xf32>
      %16 = vector.extract_strided_slice %7 {offsets = [0, 1], sizes = [32, 1], strides = [1, 1]} : vector<32x2xf32> to vector<32x1xf32>
      %17 = vector.extract_strided_slice %6 {offsets = [1, 0], sizes = [1, 512], strides = [1, 1]} : vector<2x512xf32> to vector<1x512xf32>
      %18 = vector.broadcast %16 : vector<32x1xf32> to vector<32x512xf32>
      %19 = vector.broadcast %17 : vector<1x512xf32> to vector<32x512xf32>
      %20 = arith.mulf %18, %19 : vector<32x512xf32>
      %21 = arith.addf %15, %20 : vector<32x512xf32>
      %22 = math.tanh %21 : vector<32x512xf32>
      %c0_7 = arith.constant 0 : index
      %c0_8 = arith.constant 0 : index
      %23 = vector.load %arg4[%c0_7, %c0_8] : memref<32x32xbf16, #tpu.memory_space<vmem>>, vector<32x32xbf16>
      %c0_9 = arith.constant 0 : index
      %c0_10 = arith.constant 0 : index
      %24 = vector.load %arg5[%c0_9, %c0_10] : memref<32x1xf32, #tpu.memory_space<vmem>>, vector<32x1xf32>
      %25 = arith.truncf %22 : vector<32x512xf32> to vector<32x512xbf16>
      %cst = arith.constant dense<0.000000e+00> : vector<32x512xf32>
      %26 = tpu.matmul %23, %25, %cst {dimension_numbers = #tpu.dot_dimension_numbers<[1], [0], [0], [1], [0, 0, 1, 1], [], []>} : vector<32x32xbf16>, vector<32x512xbf16>, vector<32x512xf32> -> vector<32x512xf32>
      %27 = vector.broadcast %24 : vector<32x1xf32> to vector<32x512xf32>
      %28 = arith.addf %26, %27 : vector<32x512xf32>
      %29 = math.tanh %28 : vector<32x512xf32>
      %c0_11 = arith.constant 0 : index
      %c0_12 = arith.constant 0 : index
      %30 = vector.load %arg6[%c0_11, %c0_12] : memref<32x32xbf16, #tpu.memory_space<vmem>>, vector<32x32xbf16>
      %c0_13 = arith.constant 0 : index
      %c0_14 = arith.constant 0 : index
      %31 = vector.load %arg7[%c0_13, %c0_14] : memref<32x1xf32, #tpu.memory_space<vmem>>, vector<32x1xf32>
      %32 = arith.truncf %29 : vector<32x512xf32> to vector<32x512xbf16>
      %cst_15 = arith.constant dense<0.000000e+00> : vector<32x512xf32>
      %33 = tpu.matmul %30, %32, %cst_15 {dimension_numbers = #tpu.dot_dimension_numbers<[1], [0], [0], [1], [0, 0, 1, 1], [], []>} : vector<32x32xbf16>, vector<32x512xbf16>, vector<32x512xf32> -> vector<32x512xf32>
      %34 = vector.broadcast %31 : vector<32x1xf32> to vector<32x512xf32>
      %35 = arith.addf %33, %34 : vector<32x512xf32>
      %36 = math.tanh %35 : vector<32x512xf32>
      %c0_16 = arith.constant 0 : index
      %c0_17 = arith.constant 0 : index
      %37 = vector.load %arg8[%c0_16, %c0_17] : memref<32x1xf32, #tpu.memory_space<vmem>>, vector<32x1xf32>
      %c0_18 = arith.constant 0 : index
      %c0_19 = arith.constant 0 : index
      %38 = vector.load %arg9[%c0_18, %c0_19] : memref<1x1xf32, #tpu.memory_space<vmem>>, vector<1x1xf32>
      %39 = vector.broadcast %37 : vector<32x1xf32> to vector<32x512xf32>
      %40 = arith.mulf %39, %36 : vector<32x512xf32>
      %cst_20 = arith.constant dense<0.000000e+00> : vector<512xf32>
      %41 = vector.multi_reduction <add>, %40, %cst_20 [0] : vector<32x512xf32> to vector<512xf32>
      %42 = vector.shape_cast %41 : vector<512xf32> to vector<1x512xf32>
      %43 = vector.broadcast %38 : vector<1x1xf32> to vector<1x512xf32>
      %44 = arith.addf %42, %43 : vector<1x512xf32>
      %c0_21 = arith.constant 0 : index
      %45 = arith.index_cast %4 : i32 to index
      %46 = vector.load %arg10[%c0_21, %45] : memref<1x1024xf32, #tpu.memory_space<vmem>>, vector<1x512xf32>
      tpu.vector_store %arg10[%c0_21, %45], %44 {strides = array<i32>} : memref<1x1024xf32, #tpu.memory_space<vmem>>, vector<1x512xf32>,
    }
    %c2_i32_0 = arith.constant 2 : i32
    return
  }
  func.func @transform_0(%arg0: i32) -> (i32, i32) {
    %c0_i32 = arith.constant 0 : i32
    %c0_i32_0 = arith.constant 0 : i32
    return %c0_i32, %arg0 : i32, i32
  }
  func.func @transform_1(%arg0: i32) -> (i32, i32) {
    %c0_i32 = arith.constant 0 : i32
    %c0_i32_0 = arith.constant 0 : i32
    %c0_i32_1 = arith.constant 0 : i32
    return %c0_i32, %c0_i32_0 : i32, i32
  }
  func.func @transform_2(%arg0: i32) -> (i32, i32) {
    %c0_i32 = arith.constant 0 : i32
    %c0_i32_0 = arith.constant 0 : i32
    %c0_i32_1 = arith.constant 0 : i32
    return %c0_i32, %c0_i32_0 : i32, i32
  }
  func.func @transform_3(%arg0: i32) -> (i32, i32) {
    %c0_i32 = arith.constant 0 : i32
    %c0_i32_0 = arith.constant 0 : i32
    %c0_i32_1 = arith.constant 0 : i32
    return %c0_i32, %c0_i32_0 : i32, i32
  }
  func.func @transform_4(%arg0: i32) -> (i32, i32) {
    %c0_i32 = arith.constant 0 : i32
    %c0_i32_0 = arith.constant 0 : i32
    %c0_i32_1 = arith.constant 0 : i32
    return %c0_i32, %c0_i32_0 : i32, i32
  }
  func.func @transform_5(%arg0: i32) -> (i32, i32) {
    %c0_i32 = arith.constant 0 : i32
    %c0_i32_0 = arith.constant 0 : i32
    %c0_i32_1 = arith.constant 0 : i32
    return %c0_i32, %c0_i32_0 : i32, i32
  }
  func.func @transform_6(%arg0: i32) -> (i32, i32) {
    %c0_i32 = arith.constant 0 : i32
    %c0_i32_0 = arith.constant 0 : i32
    %c0_i32_1 = arith.constant 0 : i32
    return %c0_i32, %c0_i32_0 : i32, i32
  }
  func.func @transform_7(%arg0: i32) -> (i32, i32) {
    %c0_i32 = arith.constant 0 : i32
    %c0_i32_0 = arith.constant 0 : i32
    %c0_i32_1 = arith.constant 0 : i32
    return %c0_i32, %c0_i32_0 : i32, i32
  }
  func.func @transform_8(%arg0: i32) -> (i32, i32) {
    %c0_i32 = arith.constant 0 : i32
    %c0_i32_0 = arith.constant 0 : i32
    %c0_i32_1 = arith.constant 0 : i32
    return %c0_i32, %c0_i32_0 : i32, i32
  }
  func.func @transform_9(%arg0: i32) -> (i32, i32) {
    %c0_i32 = arith.constant 0 : i32
    %c0_i32_0 = arith.constant 0 : i32
    return %c0_i32, %arg0 : i32, i32
  }
}

</mosaic_0001>

<bundles_post_ra>
// kernel: tpu_custom_call.1
= control target key start
LH: loop header
LB: loop body
LE: loop exit
PB: predicated region body
PF: predicated region fallthrough
CT: control target
= control target key end

     0   :  { %s1585_s0 = inlined_call_operand.vmem [shape: f32[2,2048], index: 0, kind: input, shape index: {}]   ;;  %s1586_s1 = inlined_call_operand.vmem [shape: f32[32,2], index: 1, kind: input, shape index: {}]   ;;  %s1587_s2 = inlined_call_operand.vmem [shape: f32[32,1], index: 2, kind: input, shape index: {}]   ;;  %s1588_s3 = inlined_call_operand.vmem [shape: bf16[32,32], index: 3, kind: input, shape index: {}]   ;;  %s1589_s4 = inlined_call_operand.vmem [shape: f32[32,1], index: 4, kind: input, shape index: {}]   ;;  %s1590_s5 = inlined_call_operand.vmem [shape: bf16[32,32], index: 5, kind: input, shape index: {}]   ;;  %s1591_s6 = inlined_call_operand.vmem [shape: f32[32,1], index: 6, kind: input, shape index: {}]   ;;  %s1592_s7 = inlined_call_operand.vmem [shape: f32[32,1], index: 7, kind: input, shape index: {}]   ;;  %s1593_s8 = inlined_call_operand.<no memory space> [shape: f32[1,1], index: 8, kind: input, shape index: {}]   ;;  %s1594_s9 = inlined_call_operand.hbm [shape: f32[1,2048], index: 9, kind: output, shape index: {}]  }
   0x1   :  { %v14_v0 = vstv %s1593_s8 }
   0x2   :  { %15 = vst [vmem:[#allocation2] sm:$0x1] %v14_v0 }
   0x3   :  { %16 = vsyncpa [#allocation4], 0 }
   0x4   :  { %18 = vsyncpa [#allocation4 + $0x1], 0  ;;  %s1326_s11 = smov 0   ;;  %s1328_s12 = smov 0  }
   0x5   :  { %s1330_s13 = smov 0   ;;  %s1332_s14 = smov 0  }
   0x6 LB: > { %s996_s8 = sadd.s32 4294967295, %s1265_s14   ;;  %s997_s15 = sadd.s32 4294967294, %s1265_s14   ;;  %s1265_s14 = sphi %s1332_s14, %s1602_s14   ;;  %s1261_s13 = sphi %s1330_s13, %s1601_s13   ;;  %s1257_s12 = sphi %s1328_s12, %s1600_s12   ;;  %s1253_s11 = sphi %s1326_s11, %s1599_s11  }
   0x7   : > { %s1349_s16 = sadd.s32 1, %s1265_s14   ;;  %s225_s17 = sadd.s32 1, %s1261_s13 }
   0x8   : > { %s222_s18 = ssub.s32 %s1265_s14, %s1349_s16  ;;  %p235_p0 = scmp.ne.s32.totalorder %s1261_s13, %s1257_s12 }
   0x9   : > { %p223_p1 = scmp.eq.s32.totalorder %s222_s18, 0  ;;  %p236_p2 = scmp.eq.s32.totalorder %s996_s8, 1 }
   0xa   : > { %p241_p3 = scmp.ne.s32.totalorder %s1257_s12, %s1253_s11  ;;  %p242_p4 = scmp.eq.s32.totalorder %s997_s15, 1 }
   0xb   : > { %s1359_s19 = scalar_select %p223_p1, %s1261_s13, %s225_s17  }
   0xc   : > { %p1361_p5 = por %p236_p2, %p235_p0  ;;  %p1365_p6 = por %p242_p4, %p241_p3 }
   0xd   : > { %p1000_p7 = scmp.ge.s32.totalorder %s1265_s14, 1  ;;  %p293_p8 = scmp.lt.s32.totalorder %s1265_s14, 3 }
   0xf   : > { %p294_p9 = pnand %p1000_p7, %p293_p8 }
  0x10   : > { %s1595_s22 = sand.u32 (!%p294_p9), 1, %s1257_s12   ;;  %s1372_s23 = sshll.u32 (!%p294_p9), %s996_s8, 3 }
  0x11   : > { %297 = sbr.rel (%p294_p9) target bundleno = 562 (0x232), region = 56  ;;  %s1376_s24 = sshll.u32 (!%p294_p9), %s1595_s22, 3 }
  0x12   : > { %p330_p10 = scmp.lt.s32.totalorder (!%p294_p9), %s1372_s23, 15  ;;  %s328_s30 = scalar_lea.vmem (!%p294_p9), [#allocation3], %s1376_s24 }
  0x13   : > { %s1386_s10 = smov (!%p294_p9), 0  }
  0x16   : > { %s331_s25 = scalar_select %p330_p10, %s1372_s23, 15 }
  0x18   : > { %s1003_s26 = sshll.u32 %s331_s25, 1 }
  0x19   : > { %s1383_s29 = scalar_lea.vmem %s1585_s0, %s1003_s26 }
  0x1a LB: >> { %v355_v1 = vld [vmem:[%s1587_s2 + $0x10] sm:$0xff]  ;;  %v1271_v3 = vmov 0   ;;  %v1272_v4 = vmov 1   ;;  %v356_v5 = vld [vmem:[%s1587_s2 + $0x18] sm:$0xff]  ;;  %v350_v7 = vld [vmem:[%s1586_s1 + $0x8] sm:$0xff]  ;;  %s1004_s27 = sshll.u32 %s1269_s10, 9  ;;  %s1269_s10 = sphi %s1386_s10, %s342_s10  }
  0x1b   : >> { %v351_v2 = vld [vmem:[%s1586_s1 + $0x10] sm:$0xff]  ;;  %1096 = vset.pattern.permute.xlu1 %v1271_v3  ;;  %1095 = vset.pattern.permute.xlu0 %v1271_v3  ;;  %v352_v6 = vld [vmem:[%s1586_s1 + $0x18] sm:$0xff]  ;;  %v349_v8 = vld [vmem:[%s1586_s1] sm:$0xff]  ;;  %s1428_s28 = sshra.s32 %s1004_s27, 7  ;;  %vm564_vm0 = vcmask 261120   ;;  %vm901_vm1 = vcmask 1040384  }
  0x1c   : >> { %418 = vperm.xlu1 %1096, %v355_v1   ;;  %369 = vperm.xlu0 %1095, %v351_v2   ;;  %v353_v9 = vld [vmem:[%s1587_s2] sm:$0xff]  ;;  %v354_v10 = vld [vmem:[%s1587_s2 + $0x8] sm:$0xff]  ;;  %v524_v11 = vld [vmem:[%s1589_s4 + $0x10] sm:$0xff]  ;;  %s1005_s8 = sshll.u32 %s1428_s28, 1  ;;  %vm903_vm2 = vcmask 1042434   ;;  %vm905_vm3 = vcmask 1041408   ;;  %s908_s15 = scalar_lea.vmem %s328_s30, %s1428_s28 [#allocation3] }
  0x1d   : >> { %1097 = vset.pattern.permute.xlu2 %v1272_v4  ;;  %v523_v12 = vld [vmem:[%s1589_s4 + $0x8] sm:$0xff]  ;;  %v669_v13 = vld [vmem:[%s1591_s6 + $0x10] sm:$0xff]  ;;  %v811_v15 = vld [vmem:[#allocation2] sm:$0x1]  ;;  %s347_s22 = scalar_lea.vmem %s1383_s29, %s1005_s8  ;;  %s342_s10 = sadd.s32 1, %s1269_s10  }
  0x1e   : >> { %451 = vperm.xlu2 %1097, %v351_v2   ;;  %v808_v14 = vld [vmem:[%s1592_s7 + $0x8] sm:$0xff]  ;;  %v348_v17 = vld [vmem:[%s347_s22] sm:$0xff]  ;;  %p339_p11 = scmp.ge.s32.totalorder %s342_s10, 2  }
  0x1f   : >> { %v378_v18 = vperm.slane %v348_v17, 0  ;;  %v379_v19 = vperm.slane %v348_v17, 2  ;;  %v458_v21 = vperm.slane %v348_v17, 1  ;;  %v380_v22 = vperm.slane %v348_v17, 4  ;;  %s925_s25 = scalar_lea.hbm (%p339_p11), %s1594_s9, %s1372_s23  ;;  %s927_s28 = sshll.u32 (%p339_p11), %s328_s30, 4  ;;  %s928_s28 = int_to_ptr.vmem [resolvable:$true] %s927_s28 }
  0x20   : >> { %v459_v25 = vperm.slane %v348_v17, 3  ;;  %v381_v28 = vperm.slane %v348_v17, 6  ;;  %v460_v33 = vperm.slane %v348_v17, 5  ;;  %v461_v37 = vperm.slane %v348_v17, 7  ;;  %s929_s26 = sshll.u32 (%p339_p11), %s925_s25, 4  ;;  %s1598_s27 = sand.u32 (%p339_p11), 1, %s1257_s12   ;;  %s930_s26 = int_to_ptr.hbm [resolvable:$true] %s929_s26 }
  0x21   : >> { %v1432_v20 = vperm.slane %v378_v18, 0  ;;  %v1434_v23 = vperm.slane %v379_v19, 0  ;;  %v1437_v30 = vperm.slane %v458_v21, 1  ;;  %v1439_v31 = vperm.slane %v380_v22, 0  ;;  %s915_s8 = scalar_lea.sflag (%p339_p11), [#allocation4], %s1598_s27  ;;  %s1213_s22 = sshra.s32 (%p339_p11), %s930_s26, 4  ;;  %s1214_s22 = int_to_ptr.hbm [resolvable:$true] %s1213_s22 }
  0x22   : >> { %v1442_v34 = vperm.slane %v459_v25, 1  ;;  %v1444_v35 = vperm.slane %v381_v28, 0  ;;  %v1450_v42 = vperm.slane %v460_v33, 1  ;;  %v1458_v52 = vperm.slane %v461_v37, 1  ;;  %s1219_s17 = scalar_lea.hbm (%p339_p11), %s1594_s9, 16  ;;  %p1220_p1 = scmp.lt.s32.totalorder (%p339_p11), %s1214_s22, %s1594_s9 }
  0x24   : >> { %423 = vperm.xlu1 %1096, %v356_v5   ;;  %374 = vperm.xlu0 %1095, %v352_v6  }
  0x26   : >> { %455 = vperm.xlu2 %1097, %v352_v6  }
  0x2c   : >> { %364 = vperm.xlu1 %1096, %v350_v7   ;;  %359 = vperm.xlu0 %1095, %v349_v8  }
  0x2e   : >> { %1098 = vset.pattern.permute.xlu2 %v1271_v3 }
  0x2f   : >> { %408 = vperm.xlu2 %1098, %v353_v9  }
  0x34   : >> { %1099 = vset.pattern.permute.xlu1 %v1272_v4  ;;  %413 = vperm.xlu0 %1095, %v354_v10  }
  0x35   : >> { %443 = vperm.xlu1 %1099, %v349_v8  }
  0x37   : >> { %1100 = vset.pattern.permute.xlu2 %v1272_v4 }
  0x38   : >> { %447 = vperm.xlu2 %1100, %v350_v7  }
  0x3c   : >> { %546 = vperm.xlu0 %1095, %v524_v11  }
  0x3d   : >> { %1101 = vset.pattern.permute.xlu1 %v1271_v3 }
  0x40   : >> { %1102 = vset.pattern.permute.xlu2 %v1271_v3 }
  0x44   : >> { %541 = vperm.xlu0 %1095, %v523_v12  }
  0x4c   : >> { %691 = vperm.xlu0 %1095, %v669_v13  }
  0x54   : >> { %819 = vperm.xlu0 %1095, %v808_v14  }
  0x5c   : >> { %886 = vperm.xlu0 %1095, %v811_v15  }
  0x78   : >> { %v452_v16 = vpop.permute.xlu2 %451 }
  0x79   : >> { %v478_v38 = vmul.f32 %v1437_v30, %v452_v16  ;;  %v479_v43 = vmul.f32 %v1442_v34, %v452_v16  ;;  %v480_v60 = vmul.f32 %v1450_v42, %v452_v16  ;;  %v481_v2 = vmul.f32 %v1458_v52, %v452_v16 }
  0x80   : >> { %v456_v24 = vpop.permute.xlu2 %455 }
  0x81   : >> { %v482_v53 = vmul.f32 %v1437_v30, %v456_v24  ;;  %v483_v56 = vmul.f32 %v1442_v34, %v456_v24  ;;  %v484_v61 = vmul.f32 %v1450_v42, %v456_v24  ;;  %v485_v4 = vmul.f32 %v1458_v52, %v456_v24 }
  0x89   : >> { %v1448_v41 = vpop.permute.xlu2 %408 }
  0x8e   : >> { %v419_v26 = vpop.permute.xlu1 %418  ;;  %v370_v27 = vpop.permute.xlu0 %369 }
  0x8f   : >> { %v398_v29 = vmul.f32 %v1432_v20, %v370_v27  ;;  %v399_v32 = vmul.f32 %v1434_v23, %v370_v27  ;;  %v400_v39 = vmul.f32 %v1439_v31, %v370_v27  ;;  %v401_v44 = vmul.f32 %v1444_v35, %v370_v27 }
  0x91   : >> { %v434_v36 = vadd.f32 %v419_v26, %v398_v29  ;;  %v435_v40 = vadd.f32 %v419_v26, %v399_v32  ;;  %v436_v54 = vadd.f32 %v419_v26, %v400_v39  ;;  %v437_v62 = vadd.f32 %v419_v26, %v401_v44 }
  0x92   : >> { %v448_v10 = vpop.permute.xlu2 %447 }
  0x93   : >> { %v494_v47 = vadd.f32 %v478_v38, %v434_v36  ;;  %v495_v55 = vadd.f32 %v479_v43, %v435_v40  ;;  %v496_v3 = vadd.f32 %v480_v60, %v436_v54  ;;  %v497_v8 = vadd.f32 %v481_v2, %v437_v62 }
  0x94   : >> { %v474_v14 = vmul.f32 %v1437_v30, %v448_v10  ;;  %v475_v15 = vmul.f32 %v1442_v34, %v448_v10  ;;  %v476_v19 = vmul.f32 %v1450_v42, %v448_v10  ;;  %v477_v33 = vmul.f32 %v1458_v52, %v448_v10  ;;  %v670_v10 = vld [vmem:[%s1591_s6 + $0x18] sm:$0xff] }
  0x95   : >> { %1103 = vtanh.f32 %v494_v47 }
  0x96   : >> { %v424_v45 = vpop.permute.xlu1 %423  ;;  %v375_v46 = vpop.permute.xlu0 %374  ;;  %1105 = vtanh.f32 %v495_v55 }
  0x97   : >> { %v402_v48 = vmul.f32 %v1432_v20, %v375_v46  ;;  %v403_v49 = vmul.f32 %v1434_v23, %v375_v46  ;;  %v404_v50 = vmul.f32 %v1439_v31, %v375_v46  ;;  %v405_v51 = vmul.f32 %v1444_v35, %v375_v46 }
  0x99   : >> { %v438_v57 = vadd.f32 %v424_v45, %v402_v48  ;;  %v439_v58 = vadd.f32 %v424_v45, %v403_v49  ;;  %v440_v59 = vadd.f32 %v424_v45, %v404_v50  ;;  %v441_v63 = vadd.f32 %v424_v45, %v405_v51 }
  0x9b   : >> { %v498_v0 = vadd.f32 %v482_v53, %v438_v57  ;;  %v499_v1 = vadd.f32 %v483_v56, %v439_v58  ;;  %v500_v5 = vadd.f32 %v484_v61, %v440_v59  ;;  %v501_v9 = vadd.f32 %v485_v4, %v441_v63  ;;  %v1104_v11 = vpop.eup %1103  ;;  %v525_v59 = vld [vmem:[%s1589_s4 + $0x18] sm:$0xff]  ;;  %v667_v63 = vld [vmem:[%s1591_s6] sm:$0xff] }
  0x9c   : >> { %v1106_v12 = vpop.eup %1105  ;;  %551 = vperm.xlu1 %1101, %v525_v59  }
  0x9d   : >> { %1107 = vtanh.f32 %v498_v0 }
  0x9e   : >> { %v365_v6 = vpop.permute.xlu1 %364  ;;  %v360_v7 = vpop.permute.xlu0 %359  ;;  %1109 = vtanh.f32 %v499_v1  ;;  %v668_v1 = vld [vmem:[%s1591_s6 + $0x8] sm:$0xff] }
  0x9f   : >> { %1111 = vtanh.f32 %v496_v3  ;;  %v394_v17 = vmul.f32 %v1432_v20, %v365_v6  ;;  %v390_v18 = vmul.f32 %v1432_v20, %v360_v7  ;;  %v395_v22 = vmul.f32 %v1434_v23, %v365_v6 }
  0xa0   : >> { %1113 = vtanh.f32 %v500_v5  ;;  %v396_v24 = vmul.f32 %v1439_v31, %v365_v6  ;;  %v397_v25 = vmul.f32 %v1444_v35, %v365_v6  ;;  %v391_v28 = vmul.f32 %v1434_v23, %v360_v7  ;;  %v1042_v6 = vld [vmem:[%s1588_s3] sm:$0xff] }
  0xa1   : >> { %1115 = vtanh.f32 %v497_v8  ;;  %v392_v29 = vmul.f32 %v1439_v31, %v360_v7  ;;  %v393_v32 = vmul.f32 %v1444_v35, %v360_v7  ;;  %v426_v45 = vadd.f32 %v1448_v41, %v390_v18 }
  0xa2   : >> { %1117 = vtanh.f32 %v501_v9  ;;  %v427_v51 = vadd.f32 %v1448_v41, %v391_v28 }
  0xa3   : >> { %v1108_v13 = vpop.eup %1107  ;;  %v428_v56 = vadd.f32 %v1448_v41, %v392_v29 }
  0xa4   : >> { %v1110_v16 = vpop.eup %1109  ;;  %v530_v21 = vpack.c.bf16 %v1108_v13, %v1104_v11  ;;  %681 = vperm.xlu1 %1101, %v667_v63   ;;  %v807_v11 = vld [vmem:[%s1592_s7] sm:$0xff]  ;;  %v810_v13 = vld [vmem:[%s1592_s7 + $0x18] sm:$0xff] }
  0xa5   : >> { %v531_v26 = vpack.c.bf16 %v1110_v16, %v1106_v12  ;;  %v1112_v27 = vpop.eup %1111  ;;  %v809_v12 = vld [vmem:[%s1592_s7 + $0x10] sm:$0xff] }
  0xa6   : >> { %v414_v20 = vpop.permute.xlu0 %413  ;;  %577 = vmatpush.bf16.msra.mxu0 %v530_v21  ;;  %v1114_v36 = vpop.eup %1113 }
  0xa7   : >> { %v430_v37 = vadd.f32 %v414_v20, %v394_v17  ;;  %v431_v38 = vadd.f32 %v414_v20, %v395_v22  ;;  %v432_v39 = vadd.f32 %v414_v20, %v396_v24  ;;  %v433_v40 = vadd.f32 %v414_v20, %v397_v25  ;;  %596 = vmatpush.bf16.msra.mxu1 %v531_v26  ;;  %v444_v43 = vpop.permute.xlu1 %443  ;;  %v1116_v44 = vpop.eup %1115 }
  0xa8   : >> { %v532_v46 = vpack.c.bf16 %v1114_v36, %v1112_v27  ;;  %v470_v23 = vmul.f32 %v1437_v30, %v444_v43  ;;  %v471_v31 = vmul.f32 %v1442_v34, %v444_v43  ;;  %v1118_v35 = vpop.eup %1117  ;;  %v472_v50 = vmul.f32 %v1450_v42, %v444_v43 }
  0xa9   : >> { %v490_v47 = vadd.f32 %v474_v14, %v430_v37  ;;  %v491_v48 = vadd.f32 %v475_v15, %v431_v38  ;;  %v492_v49 = vadd.f32 %v476_v19, %v432_v39  ;;  %v493_v53 = vadd.f32 %v477_v33, %v433_v40  ;;  %v1043_v14 = vld [vmem:[%s1588_s3 + $0x8] sm:$0xff] }
  0xaa   : >> { %615 = vmatpush.bf16.msra.mxu2 %v532_v46  ;;  %v533_v54 = vpack.c.bf16 %v1118_v35, %v1116_v44  ;;  %v473_v55 = vmul.f32 %v1458_v52, %v444_v43  ;;  %v486_v57 = vadd.f32 %v470_v23, %v426_v45  ;;  %v429_v30 = vadd.f32 %v1448_v41, %v393_v32  ;;  %v522_v52 = vld [vmem:[%s1589_s4] sm:$0xff] }
  0xab   : >> { %1119 = vtanh.f32 %v490_v47  ;;  %v487_v34 = vadd.f32 %v471_v31, %v427_v51  ;;  %v488_v58 = vadd.f32 %v472_v50, %v428_v56  ;;  %536 = vperm.xlu2 %1102, %v522_v52  }
  0xac   : >> { %1121 = vtanh.f32 %v491_v48  ;;  %634 = vmatpush.bf16.msra.mxu3 %v533_v54  ;;  %v489_v42 = vadd.f32 %v473_v55, %v429_v30  ;;  %696 = vperm.xlu1 %1101, %v670_v10  }
  0xad   : >> { %1123 = vtanh.f32 %v492_v49 }
  0xae   : >> { %1125 = vtanh.f32 %v493_v53  ;;  %v547_v22 = vpop.permute.xlu0 %546 }
  0xaf   : >> { %1127 = vtanh.f32 %v486_v57 }
  0xb0   : >> { %1129 = vtanh.f32 %v487_v34 }
  0xb1   : >> { %v1120_v41 = vpop.eup %1119  ;;  %1131 = vtanh.f32 %v488_v58 }
  0xb2   : >> { %v1122_v60 = vpop.eup %1121  ;;  %1133 = vtanh.f32 %v489_v42 }
  0xb3   : >> { %v1124_v61 = vpop.eup %1123  ;;  %686 = vperm.xlu2 %1102, %v668_v1  }
  0xb4   : >> { %v1126_v62 = vpop.eup %1125  ;;  %824 = vperm.xlu1 %1101, %v809_v12   ;;  %v1045_v12 = vld [vmem:[%s1590_s5 + $0x8] sm:$0xff] }
  0xb5   : >> { %v1128_v0 = vpop.eup %1127 }
  0xb6   : >> { %v1130_v2 = vpop.eup %1129  ;;  %v526_v3 = vpack.c.bf16 %v1120_v41, %v1128_v0  ;;  %v542_v44 = vpop.permute.xlu0 %541 }
  0xb7   : >> { %v1132_v4 = vpop.eup %1131  ;;  %v527_v5 = vpack.c.bf16 %v1122_v60, %v1130_v2  ;;  %v1044_v2 = vld [vmem:[%s1590_s5] sm:$0xff] }
  0xb8   : >> { %v1134_v7 = vpop.eup %1133  ;;  %578 = vmatpush.bf16.msra.mxu0 %v526_v3  ;;  %v528_v8 = vpack.c.bf16 %v1124_v61, %v1132_v4 }
  0xb9   : >> { %597 = vmatpush.bf16.msra.mxu1 %v527_v5  ;;  %v529_v9 = vpack.c.bf16 %v1126_v62, %v1134_v7 }
  0xba   : >> { %616 = vmatpush.bf16.msra.mxu2 %v528_v8 }
  0xbb   : >> { %635 = vmatpush.bf16.msra.mxu3 %v529_v9  ;;  %1014 = vmatmul.msk.bf16.vlgmr.msra.gmra.mxu0 %vm564_vm0, %v1042_v6 }
  0xbc   : >> { %1016 = vmatmul.msk.bf16.vlgmr.msra.gmra.mxu1 %vm564_vm0, %v1042_v6  ;;  %814 = vperm.xlu2 %1102, %v807_v11  }
  0xbd   : >> { %1018 = vmatmul.msk.bf16.vlgmr.msra.gmra.mxu2 %vm564_vm0, %v1042_v6 }
  0xbe   : >> { %1020 = vmatmul.msk.bf16.vlgmr.msra.gmra.mxu3 %vm564_vm0, %v1042_v6 }
  0xc4   : >> { %829 = vperm.xlu2 %1102, %v810_v13  }
  0xcb   : >> { %1015 = vmatmul.msk.bf16.gmra.mxu0 %vm564_vm0, %v1043_v14 }
  0xcc   : >> { %1017 = vmatmul.msk.bf16.gmra.mxu1 %vm564_vm0, %v1043_v14 }
  0xcd   : >> { %1019 = vmatmul.msk.bf16.gmra.mxu2 %vm564_vm0, %v1043_v14 }
  0xce   : >> { %1021 = vmatmul.msk.bf16.gmra.mxu3 %vm564_vm0, %v1043_v14 }
 0x105   : >> { %v537_v28 = vpop.permute.xlu2 %536 }
 0x10e   : >> { %v552_v33 = vpop.permute.xlu1 %551 }
 0x138   : >> { %v580_v15 = vpop.f32.mrf.mxu0 }
 0x139   : >> { %v599_v16 = vpop.f32.mrf.mxu1  ;;  %v581_v29 = vadd.f32 %v580_v15, %v537_v28 }
 0x13a   : >> { %v600_v32 = vadd.f32 %v599_v16, %v537_v28 }
 0x13b   : >> { %1135 = vtanh.f32 %v581_v29 }
 0x13c   : >> { %1137 = vtanh.f32 %v600_v32 }
 0x140   : >> { %v618_v17 = vpop.f32.mrf.mxu2  ;;  %v582_v18 = vpop.f32.mrf.mxu0 }
 0x141   : >> { %v637_v19 = vpop.f32.mrf.mxu3  ;;  %v601_v21 = vpop.f32.mrf.mxu1  ;;  %v583_v46 = vadd.f32 %v582_v18, %v542_v44  ;;  %v619_v34 = vadd.f32 %v618_v17, %v537_v28 }
 0x142   : >> { %v602_v23 = vadd.f32 %v601_v21, %v542_v44  ;;  %v1136_v47 = vpop.eup %1135  ;;  %v638_v42 = vadd.f32 %v637_v19, %v537_v28  ;;  %v682_v17 = vpop.permute.xlu1 %681 }
 0x143   : >> { %v1138_v48 = vpop.eup %1137  ;;  %v687_v19 = vpop.permute.xlu2 %686 }
 0x148   : >> { %v620_v24 = vpop.f32.mrf.mxu2  ;;  %v585_v25 = vpop.f32.mrf.mxu0 }
 0x149   : >> { %v639_v26 = vpop.f32.mrf.mxu3  ;;  %v604_v27 = vpop.f32.mrf.mxu1  ;;  %v586_v20 = vadd.f32 %v585_v25, %v547_v22  ;;  %v621_v51 = vadd.f32 %v620_v24, %v542_v44 }
 0x14a   : >> { %v605_v36 = vadd.f32 %v604_v27, %v547_v22  ;;  %v640_v56 = vadd.f32 %v639_v26, %v542_v44  ;;  %v692_v26 = vpop.permute.xlu0 %691 }
 0x14b   : >> { %1139 = vtanh.f32 %v586_v20  ;;  %v697_v20 = vpop.permute.xlu1 %696 }
 0x14c   : >> { %1141 = vtanh.f32 %v605_v36 }
 0x150   : >> { %v623_v37 = vpop.f32.mrf.mxu2  ;;  %v587_v38 = vpop.f32.mrf.mxu0 }
 0x151   : >> { %v642_v39 = vpop.f32.mrf.mxu3  ;;  %v588_v40 = vadd.f32 %v587_v38, %v552_v33  ;;  %v606_v43 = vpop.f32.mrf.mxu1  ;;  %v624_v31 = vadd.f32 %v623_v37, %v547_v22 }
 0x152   : >> { %v607_v45 = vadd.f32 %v606_v43, %v552_v33  ;;  %v643_v35 = vadd.f32 %v642_v39, %v547_v22  ;;  %v1140_v50 = vpop.eup %1139  ;;  %v1538_v39 = vpop.permute.xlu2 %814 }
 0x153   : >> { %1143 = vtanh.f32 %v588_v40  ;;  %v1142_v55 = vpop.eup %1141 }
 0x154   : >> { %1145 = vtanh.f32 %v607_v45 }
 0x155   : >> { %1147 = vtanh.f32 %v583_v46 }
 0x156   : >> { %1149 = vtanh.f32 %v602_v23 }
 0x157   : >> { %1151 = vtanh.f32 %v624_v31 }
 0x158   : >> { %v625_v49 = vpop.f32.mrf.mxu2  ;;  %1153 = vtanh.f32 %v643_v35 }
 0x159   : >> { %v626_v53 = vadd.f32 %v625_v49, %v552_v33  ;;  %v644_v54 = vpop.f32.mrf.mxu3  ;;  %v1144_v30 = vpop.eup %1143 }
 0x15a   : >> { %v645_v57 = vadd.f32 %v644_v54, %v552_v33  ;;  %v1146_v58 = vpop.eup %1145  ;;  %v675_v59 = vpack.c.bf16 %v1144_v30, %v1140_v50 }
 0x15b   : >> { %1155 = vtanh.f32 %v626_v53  ;;  %v1148_v52 = vpop.eup %1147  ;;  %v676_v41 = vpack.c.bf16 %v1146_v58, %v1142_v55 }
 0x15c   : >> { %1157 = vtanh.f32 %v645_v57  ;;  %v1150_v60 = vpop.eup %1149  ;;  %721 = vmatpush.bf16.msrb.mxu0 %v675_v59  ;;  %v671_v63 = vpack.c.bf16 %v1148_v52, %v1136_v47 }
 0x15d   : >> { %1159 = vtanh.f32 %v621_v51  ;;  %v1152_v61 = vpop.eup %1151  ;;  %740 = vmatpush.bf16.msrb.mxu1 %v676_v41  ;;  %v672_v1 = vpack.c.bf16 %v1150_v60, %v1138_v48  ;;  %v820_v51 = vpop.permute.xlu0 %819 }
 0x15e   : >> { %1161 = vtanh.f32 %v640_v56  ;;  %v1154_v62 = vpop.eup %1153 }
 0x15f   : >> { %1163 = vtanh.f32 %v619_v34  ;;  %v825_v34 = vpop.permute.xlu1 %824 }
 0x160   : >> { %1165 = vtanh.f32 %v638_v42  ;;  %722 = vmatpush.bf16.msrb.mxu0 %v671_v63 }
 0x161   : >> { %v1156_v0 = vpop.eup %1155  ;;  %741 = vmatpush.bf16.msrb.mxu1 %v672_v1 }
 0x162   : >> { %v1158_v3 = vpop.eup %1157  ;;  %v677_v4 = vpack.c.bf16 %v1156_v0, %v1152_v61  ;;  %v830_v61 = vpop.permute.xlu2 %829 }
 0x163   : >> { %v1160_v5 = vpop.eup %1159  ;;  %v678_v6 = vpack.c.bf16 %v1158_v3, %v1154_v62  ;;  %1030 = vmatmul.msk.bf16.vlgmr.msrb.gmra.mxu0 %vm564_vm0, %v1044_v2 }
 0x164   : >> { %v1162_v7 = vpop.eup %1161  ;;  %759 = vmatpush.bf16.msrb.mxu2 %v677_v4  ;;  %1032 = vmatmul.msk.bf16.vlgmr.msrb.gmra.mxu1 %vm564_vm0, %v1044_v2 }
 0x165   : >> { %v1164_v8 = vpop.eup %1163  ;;  %778 = vmatpush.bf16.msrb.mxu3 %v678_v6 }
 0x166   : >> { %v1166_v9 = vpop.eup %1165  ;;  %v673_v10 = vpack.c.bf16 %v1160_v5, %v1164_v8 }
 0x167   : >> { %v674_v11 = vpack.c.bf16 %v1162_v7, %v1166_v9 }
 0x168   : >> { %760 = vmatpush.bf16.msrb.mxu2 %v673_v10 }
 0x169   : >> { %779 = vmatpush.bf16.msrb.mxu3 %v674_v11 }
 0x16b   : >> { %1034 = vmatmul.msk.bf16.vlgmr.msrb.gmra.mxu2 %vm564_vm0, %v1044_v2 }
 0x16c   : >> { %1036 = vmatmul.msk.bf16.vlgmr.msrb.gmra.mxu3 %vm564_vm0, %v1044_v2 }
 0x173   : >> { %1031 = vmatmul.msk.bf16.gmra.mxu0 %vm564_vm0, %v1045_v12 }
 0x174   : >> { %1033 = vmatmul.msk.bf16.gmra.mxu1 %vm564_vm0, %v1045_v12 }
 0x17b   : >> { %1035 = vmatmul.msk.bf16.gmra.mxu2 %vm564_vm0, %v1045_v12 }
 0x17c   : >> { %1037 = vmatmul.msk.bf16.gmra.mxu3 %vm564_vm0, %v1045_v12 }
 0x1e0   : >> { %v724_v13 = vpop.f32.mrf.mxu0 }
 0x1e1   : >> { %v743_v14 = vpop.f32.mrf.mxu1  ;;  %v725_v21 = vadd.f32 %v724_v13, %v682_v17 }
 0x1e2   : >> { %v744_v24 = vadd.f32 %v743_v14, %v682_v17 }
 0x1e3   : >> { %1167 = vtanh.f32 %v725_v21 }
 0x1e4   : >> { %1169 = vtanh.f32 %v744_v24 }
 0x1e8   : >> { %v726_v15 = vpop.f32.mrf.mxu0 }
 0x1e9   : >> { %v745_v16 = vpop.f32.mrf.mxu1  ;;  %v727_v25 = vadd.f32 %v726_v15, %v687_v19  ;;  %v1168_v38 = vpop.eup %1167 }
 0x1ea   : >> { %v746_v27 = vadd.f32 %v745_v16, %v687_v19  ;;  %v1170_v40 = vpop.eup %1169  ;;  %v832_v58 = vmul.f32 %v1168_v38, %v1538_v39 }
 0x1eb   : >> { %1171 = vtanh.f32 %v727_v25  ;;  %v833_v59 = vmul.f32 %v1170_v40, %v1538_v39 }
 0x1ec   : >> { %1173 = vtanh.f32 %v746_v27 }
 0x1ee   : >> { %v762_v18 = vpop.f32.mrf.mxu2 }
 0x1ef   : >> { %v781_v22 = vpop.f32.mrf.mxu3  ;;  %v763_v45 = vadd.f32 %v762_v18, %v682_v17 }
 0x1f0   : >> { %v729_v28 = vpop.f32.mrf.mxu0  ;;  %v782_v35 = vadd.f32 %v781_v22, %v682_v17 }
 0x1f1   : >> { %v730_v29 = vadd.f32 %v729_v28, %v692_v26  ;;  %v748_v32 = vpop.f32.mrf.mxu1  ;;  %v1172_v44 = vpop.eup %1171 }
 0x1f2   : >> { %v749_v33 = vadd.f32 %v748_v32, %v692_v26  ;;  %v1174_v31 = vpop.eup %1173  ;;  %v836_v55 = vmul.f32 %v1172_v44, %v820_v51 }
 0x1f3   : >> { %1175 = vtanh.f32 %v730_v29  ;;  %v837_v56 = vmul.f32 %v1174_v31, %v820_v51 }
 0x1f4   : >> { %1177 = vtanh.f32 %v749_v33  ;;  %v848_v62 = vadd.f32 %v836_v55, %v832_v58 }
 0x1f5   : >> { %v857_v63 = vadd.f32 %v837_v56, %v833_v59 }
 0x1f6   : >> { %v764_v36 = vpop.f32.mrf.mxu2 }
 0x1f7   : >> { %v783_v37 = vpop.f32.mrf.mxu3  ;;  %v765_v49 = vadd.f32 %v764_v36, %v687_v19 }
 0x1f8   : >> { %v731_v43 = vpop.f32.mrf.mxu0  ;;  %v784_v53 = vadd.f32 %v783_v37, %v687_v19 }
 0x1f9   : >> { %v732_v46 = vadd.f32 %v731_v43, %v697_v20  ;;  %v750_v23 = vpop.f32.mrf.mxu1  ;;  %v1176_v48 = vpop.eup %1175 }
 0x1fa   : >> { %v751_v47 = vadd.f32 %v750_v23, %v697_v20  ;;  %v1178_v50 = vpop.eup %1177  ;;  %v840_v52 = vmul.f32 %v1176_v48, %v825_v34 }
 0x1fb   : >> { %1179 = vtanh.f32 %v732_v46  ;;  %v841_v41 = vmul.f32 %v1178_v50, %v825_v34  ;;  %v887_v50 = vpop.permute.xlu0 %886 }
 0x1fc   : >> { %1181 = vtanh.f32 %v751_v47  ;;  %v849_v3 = vadd.f32 %v848_v62, %v840_v52  ;;  %v889_v56 = vperm.slane %v887_v50, 0 }
 0x1fd   : >> { %1183 = vtanh.f32 %v763_v45  ;;  %v858_v4 = vadd.f32 %v857_v63, %v841_v41 }
 0x1fe   : >> { %v767_v54 = vpop.f32.mrf.mxu2  ;;  %1185 = vtanh.f32 %v782_v35 }
 0x1ff   : >> { %v768_v57 = vadd.f32 %v767_v54, %v692_v26  ;;  %v786_v30 = vpop.f32.mrf.mxu3  ;;  %1187 = vtanh.f32 %v765_v49 }
 0x200   : >> { %v787_v42 = vadd.f32 %v786_v30, %v692_v26  ;;  %1189 = vtanh.f32 %v784_v53 }
 0x201   : >> { %v1180_v60 = vpop.eup %1179  ;;  %1191 = vtanh.f32 %v768_v57 }
 0x202   : >> { %v1182_v0 = vpop.eup %1181  ;;  %v844_v1 = vmul.f32 %v1180_v60, %v830_v61  ;;  %1193 = vtanh.f32 %v787_v42 }
 0x203   : >> { %v1184_v2 = vpop.eup %1183  ;;  %v845_v5 = vmul.f32 %v1182_v0, %v830_v61 }
 0x204   : >> { %v1186_v6 = vpop.eup %1185  ;;  %v850_v9 = vadd.f32 %v849_v3, %v844_v1  ;;  %v834_v24 = vmul.f32 %v1184_v2, %v1538_v39 }
 0x205   : >> { %v1188_v8 = vpop.eup %1187  ;;  %v859_v10 = vadd.f32 %v858_v4, %v845_v5  ;;  %v835_v26 = vmul.f32 %v1186_v6, %v1538_v39 }
 0x206   : >> { %v769_v7 = vpop.f32.mrf.mxu2  ;;  %v1190_v13 = vpop.eup %1189  ;;  %v838_v18 = vmul.f32 %v1188_v8, %v820_v51  ;;  %v851_v21 = vrot.slane %v850_v9, 4 }
 0x207   : >> { %v770_v11 = vadd.f32 %v769_v7, %v697_v20  ;;  %v788_v12 = vpop.f32.mrf.mxu3  ;;  %v1192_v15 = vpop.eup %1191  ;;  %v860_v16 = vrot.slane %v859_v10, 4  ;;  %v839_v19 = vmul.f32 %v1190_v13, %v820_v51 }
 0x208   : >> { %v789_v14 = vadd.f32 %v788_v12, %v697_v20  ;;  %v1194_v17 = vpop.eup %1193  ;;  %v842_v25 = vmul.f32 %v1192_v15, %v825_v34  ;;  %v866_v29 = vadd.f32 %v838_v18, %v834_v24  ;;  %v852_v20 = vadd.f32 %v851_v21, %v850_v9 }
 0x209   : >> { %1195 = vtanh.f32 %v770_v11  ;;  %v861_v22 = vadd.f32 %v860_v16, %v859_v10  ;;  %v843_v28 = vmul.f32 %v1194_v17, %v825_v34  ;;  %v875_v33 = vadd.f32 %v839_v19, %v835_v26 }
 0x20a   : >> { %1197 = vtanh.f32 %v789_v14  ;;  %v867_v37 = vadd.f32 %v866_v29, %v842_v25  ;;  %v853_v46 = vrot.slane %v852_v20, 2 }
 0x20b   : >> { %v862_v27 = vrot.slane %v861_v22, 2  ;;  %v876_v43 = vadd.f32 %v875_v33, %v843_v28 }
 0x20c   : >> { %v854_v39 = vadd.f32 %v853_v46, %v852_v20 }
 0x20d   : >> { %v863_v40 = vadd.f32 %v862_v27, %v861_v22 }
 0x20e   : >> { %v855_v57 = vrot.slane %v854_v39, 1 }
 0x20f   : >> { %v1196_v32 = vpop.eup %1195  ;;  %v864_v35 = vrot.slane %v863_v40, 1 }
 0x210   : >> { %v1198_v36 = vpop.eup %1197  ;;  %v846_v38 = vmul.f32 %v1196_v32, %v830_v61  ;;  %v856_v52 = vadd.f32 %v855_v57, %v854_v39 }
 0x211   : >> { %v847_v44 = vmul.f32 %v1198_v36, %v830_v61  ;;  %v865_v53 = vadd.f32 %v864_v35, %v863_v40  ;;  %v909_v61 = vlaneseq }
 0x212   : >> { %v868_v45 = vadd.f32 %v867_v37, %v846_v38  ;;  %v890_v1 = vadd.f32 %v889_v56, %v856_v52 }
 0x213   : >> { %v877_v23 = vadd.f32 %v876_v43, %v847_v44  ;;  %v891_v58 = vadd.f32 %v889_v56, %v865_v53  ;;  %vm911_vm4 = vcmp.lt.s32.totalorder %v909_v61, 512 }
 0x214   : >> { %v869_v31 = vrot.slane %v868_v45, 4 }
 0x215   : >> { %v878_v47 = vrot.slane %v877_v23, 4  ;;  %v898_v62 = vrot.slane %v891_v58, 7 }
 0x216   : >> { %v870_v48 = vadd.f32 %v869_v31, %v868_v45 }
 0x217   : >> { %v879_v49 = vadd.f32 %v878_v47, %v877_v23  ;;  %v902_v3 = vsel %vm901_vm1, %v890_v1, %v898_v62 }
 0x218   : >> { %v871_v51 = vrot.slane %v870_v48, 2 }
 0x219   : >> { %v880_v54 = vrot.slane %v879_v49, 2 }
 0x21a   : >> { %v872_v55 = vadd.f32 %v871_v51, %v870_v48 }
 0x21b   : >> { %v881_v30 = vadd.f32 %v880_v54, %v879_v49 }
 0x21c   : >> { %v873_v34 = vrot.slane %v872_v55, 1 }
 0x21d   : >> { %v882_v42 = vrot.slane %v881_v30, 1 }
 0x21e   : >> { %v874_v59 = vadd.f32 %v873_v34, %v872_v55 }
 0x21f   : >> { %v883_v41 = vadd.f32 %v882_v42, %v881_v30 }
 0x220   : >> { %v892_v60 = vadd.f32 %v889_v56, %v874_v59 }
 0x221   : >> { %v893_v63 = vadd.f32 %v889_v56, %v883_v41 }
 0x222   : >> { %v899_v0 = vrot.slane %v892_v60, 6 }
 0x223   : >> { %v900_v2 = vrot.slane %v893_v63, 5  ;;  %341 = sbr.rel (!%p339_p11) target bundleno = 26 (0x1a), region = 100 }
 0x225   : >> { %v904_v4 = vsel %vm903_vm2, %v899_v0, %v900_v2 }
 0x226   : >> { %v906_v5 = vsel %vm905_vm3, %v902_v3, %v904_v4 }
 0x227   : >> { %913 = vst.msk [vmem:[%s908_s15] sm:$0xf] %vm911_vm4, %v906_v5  ;;  %s1215_s15 = scalar_lea.hbm (%p339_p11), %s1214_s22, 8 }
 0x228   : > { %p1216_p12 = scmp.ne.s32.totalorder %s1214_s22, %s1215_s15  ;;  %p1221_p2 = scmp.lt.s32.totalorder %s1219_s17, %s1215_s15 }
 0x22a   : > { %p1217_p13 = pnand %p1216_p12, %p1361_p5  ;;  %p1222_p3 = por %p1221_p2, %p1220_p1 }
 0x22c   : > { %p1218_p0 = pneg %p1217_p13 }
 0x22e   : > { %p1223_p4 = pnand %p1222_p3, %p1218_p0 }
 0x230   : > { %1226 = shalt.err (!%p1223_p4)
}
 0x231   : > { %1046 = dma.vmem_to_hbm [thread:$0]  (%p1361_p5), %s928_s28, 128, %s930_s26, %s915_s8  }
 0x232 PF: > { %p1052_p7 = scmp.ge.s32.totalorder %s1265_s14, 2  ;;  %s941_s24 = sand.u32 1, %s1253_s11  }
 0x233   : > { %s942_s30 = scalar_lea.sflag [#allocation4], %s941_s24 }
 0x234   : > { %p1049_p8 = pnand %p1052_p7, %p1365_p6 }
 0x236   : > { %p1050_p9 = pneg %p1049_p8 }
 0x238   : > { %1248 = dma.done.wait (%p1050_p9), %s942_s30, 128  }
 0x239   : > { %1250 = vsyncadd (%p1050_p9), %s942_s30, 4294967168  ;;  %p21_p10 = scmp.ge.s32.totalorder %s1349_s16, 4   ;;  %s1599_s11 = smov %s1257_s12 }
 0x23a   : > { %s1600_s12 = smov %s1261_s13  ;;  %s1601_s13 = smov %s1359_s19 }
 0x23b   : > { %s1602_s14 = smov %s1349_s16  ;;  %23 = sbr.rel (!%p21_p10) target bundleno = 6 (0x6), region = 111 }
 0x240   :  { %948 = vsyncpa [#allocation4], 1 }
 0x241   :  { %950 = vsyncpa [#allocation4 + $0x1], 1 }

</bundles_post_ra>
